<compile_context>
chip_gen: v7x
topology: tpu7x:2x2x1
jax: 0.10.0
libtpu: 0.0.40
codegen_flags: <defaults>
</compile_context>

<pallas_src>
import functools

import jax
import jax.numpy as jnp
from jax.experimental import pallas as pl
from jax.experimental.pallas import tpu as pltpu


NEG_SLOPE = 0.01   # nn.LeakyReLU default
COS_EPS = 1e-8     # torch.cosine_similarity default


def _leaky(x):
    return jnp.where(x > 0, x, NEG_SLOPE * x)


def dssm_kernel(q1_ref, q2_ref, emb_ref,
                w1_ref, b1_ref, w2_ref, b2_ref, w3_ref, b3_ref,
                out_ref):
    """Fused DSSM forward for one batch tile.

    q1_ref, q2_ref : (TB, S) int32 token ids
    emb_ref        : (V, E) f32 embedding table (VMEM resident)
    w*_ref         : (in, out) bf16 weights ; b*_ref : (1, out) f32 biases
    out_ref        : (TB, 128) f32 slab; col 0 = logits, col 1 = pred
    """
    TB, S = q1_ref.shape
    V = emb_ref.shape[0]

    # --- fused embedding bag: emb[ids].sum(1) == counts @ emb --------------
    ids = jnp.concatenate([q1_ref[...], q2_ref[...]], axis=0)      # (2TB, S)
    vocab_row = jax.lax.broadcasted_iota(jnp.int32, (1, V), 1)     # (1, V)
    counts = jnp.zeros((2 * TB, V), jnp.float32)
    for s in range(S):                                             # static unroll
        counts = counts + (ids[:, s:s + 1] == vocab_row).astype(jnp.float32)
    x = jnp.dot(counts, emb_ref[...], preferred_element_type=jnp.float32)

    # --- shared 3-layer MLP, both towers in one matmul stream --------------
    def layer(h, w_ref, b_ref):
        y = jnp.dot(h.astype(w_ref.dtype), w_ref[...],
                    preferred_element_type=jnp.float32) + b_ref[...]
        return _leaky(y)

    h = layer(x, w1_ref, b1_ref)        # (2TB, 256)
    h = layer(h, w2_ref, b2_ref)        # (2TB, 128)
    h = layer(h, w3_ref, b3_ref)        # (2TB, 64)

    a = h[:TB, :]
    b = h[TB:, :]

    # --- cosine similarity (per-norm eps clamp, as torch does) -------------
    dot = jnp.sum(a * b, axis=-1, keepdims=True)                   # (TB, 1)
    na = jnp.maximum(jnp.sqrt(jnp.sum(a * a, axis=-1, keepdims=True)), COS_EPS)
    nb = jnp.maximum(jnp.sqrt(jnp.sum(b * b, axis=-1, keepdims=True)), COS_EPS)
    cosine = dot * pl.reciprocal(na * nb, approx=True)

    logits = jnp.clip(_leaky(cosine), 0.0, 1.0)                    # (TB, 1)
    pred = jnp.where(logits >= 0.5, 1.0, 0.0)                      # (TB, 1)

    # --- lane-dense output slab --------------------------------------------
    col = jax.lax.broadcasted_iota(jnp.int32, (TB, 128), 1)
    out_ref[...] = jnp.where(col == 0, logits,
                             jnp.where(col == 1, pred, 0.0))


def dssm_forward(q1, q2, params, labels=None):
    """Full DSSM forward; everything after tokenization runs in one Pallas call."""
    B, S = q1.shape
    emb = params["embedding"].astype(jnp.float32)
    V, E = emb.shape

    # Batch tile: 128 rows/tower -> 256 stacked MXU rows (fills v6e/v7x 256x256
    # MXU, 2 passes of v5e's 128x128).  Small batches run as a single block.
    if B > 128:
        TB = 128
    else:
        TB = max(8, ((B + 7) // 8) * 8)
    Bp = ((B + TB - 1) // TB) * TB
    if Bp != B:
        q1 = jnp.pad(q1, ((0, Bp - B), (0, 0)))
        q2 = jnp.pad(q2, ((0, Bp - B), (0, 0)))
    q1 = q1.astype(jnp.int32)
    q2 = q2.astype(jnp.int32)

    # bf16 weights (MXU-native, halves weight DMA); biases stay f32.
    w1 = params["w1"].astype(jnp.bfloat16)
    w2 = params["w2"].astype(jnp.bfloat16)
    w3 = params["w3"].astype(jnp.bfloat16)
    b1, b2, b3 = params["b1"], params["b2"], params["b3"]

    def full_spec(shape):
        return pl.BlockSpec(shape, lambda i, _n=len(shape): (0,) * _n)

    out = pl.pallas_call(
        dssm_kernel,
        out_shape=jax.ShapeDtypeStruct((Bp, 128), jnp.float32),
        grid_spec=pltpu.PrefetchScalarGridSpec(
            num_scalar_prefetch=0,
            grid=(Bp // TB,),
            in_specs=[
                pl.BlockSpec((TB, S), lambda i: (i, 0)),   # q1 ids
                pl.BlockSpec((TB, S), lambda i: (i, 0)),   # q2 ids
                full_spec((V, E)),                         # embedding table
                full_spec((E, 256)), full_spec((1, 256)),  # fc1
                full_spec((256, 128)), full_spec((1, 128)),# fc2
                full_spec((128, 64)), full_spec((1, 64)),  # fc3
            ],
            out_specs=pl.BlockSpec((TB, 128), lambda i: (i, 0)),
        ),
        compiler_params=pltpu.CompilerParams(
            dimension_semantics=("parallel",)),   # shards batch tiles on v7x
    )(q1, q2, emb, w1, b1, w2, b2, w3, b3)
    # TODO(synk): for large vocab, keep the embedding table in HBM
    # (memory_space=pl.ANY) and DMA/gather only the needed rows instead of
    # holding (V, E) resident in VMEM.

    logits = out[:B, 0]
    pred = out[:B, 1]
    output = (logits, pred)

    if labels is not None:
        # nn.BCEWithLogitsLoss (mean reduction) on the clamped logits,
        # matching the reference forward.
        y = labels.astype(jnp.float32)
        x = logits
        loss = jnp.mean(jnp.maximum(x, 0.0) - x * y
                        + jnp.log1p(jnp.exp(-jnp.abs(x))))
        output += (loss,)
    return output


def init_params(key, vocab_size, embed_dim):
    """Parameter init mirroring the PyTorch module's __init__."""
    k_emb, k1, k2, k3 = jax.random.split(key, 4)

    def xavier_uniform(k, fan_in, fan_out):
        limit = jnp.sqrt(6.0 / (fan_in + fan_out))
        # stored as (in, out) so the kernel does x @ W directly
        return jax.random.uniform(k, (fan_in, fan_out), jnp.float32, -limit, limit)

    return {
        # nn.Embedding default init: N(0, 1)
        "embedding": jax.random.normal(k_emb, (vocab_size, embed_dim), jnp.float32),
        "w1": xavier_uniform(k1, embed_dim, 256),
        "b1": jnp.zeros((1, 256), jnp.float32),
        "w2": xavier_uniform(k2, 256, 128),
        "b2": jnp.zeros((1, 128), jnp.float32),
        "w3": xavier_uniform(k3, 128, 64),
        "b3": jnp.zeros((1, 64), jnp.float32),
    }
    # TODO(synk): biases use zeros instead of PyTorch nn.Linear's default
    # uniform init; _initialize_weights only re-inits weights (xavier_uniform).


if __name__ == "__main__":
    key = jax.random.PRNGKey(0)
    VOCAB, EMBED, BATCH, SEQ = 50, 32, 8, 8

    k_param, k_q1, k_q2, k_lab = jax.random.split(key, 4)
    params = init_params(k_param, VOCAB, EMBED)

    q1 = jax.random.randint(k_q1, (BATCH, SEQ), 0, VOCAB, dtype=jnp.int32)
    q2 = jax.random.randint(k_q2, (BATCH, SEQ), 0, VOCAB, dtype=jnp.int32)
    labels = jax.random.randint(k_lab, (BATCH,), 0, 2, dtype=jnp.int32)

    logits, pred, loss = dssm_forward(q1, q2, params, labels=labels)
    jax.block_until_ready((logits, pred, loss))

    assert logits.shape == (BATCH,) and pred.shape == (BATCH,)
    assert loss.shape == ()
    assert bool(jnp.all((logits >= 0.0) & (logits <= 1.0)))
    assert bool(jnp.all((pred == 0.0) | (pred == 1.0)))
    assert bool(jnp.isfinite(loss))
    print("KERNEL_OK")
</pallas_src>

<mosaic_0001>
module attributes {stable_mosaic.version = 11 : i64} {
  func.func @dssm_kernel(%arg0: i32, %arg1: memref<8x8xi32, #tpu.memory_space<vmem>>, %arg2: memref<8x8xi32, #tpu.memory_space<vmem>>, %arg3: memref<50x32xf32, #tpu.memory_space<vmem>>, %arg4: memref<32x256xbf16, #tpu.memory_space<vmem>>, %arg5: memref<1x256xf32, #tpu.memory_space<vmem>>, %arg6: memref<256x128xbf16, #tpu.memory_space<vmem>>, %arg7: memref<1x128xf32, #tpu.memory_space<vmem>>, %arg8: memref<128x64xbf16, #tpu.memory_space<vmem>>, %arg9: memref<1x64xf32, #tpu.memory_space<vmem>>, %arg10: memref<8x128xf32, #tpu.memory_space<vmem>>) attributes {dimension_semantics = [#tpu.dimension_semantics<parallel>], iteration_bounds = array<i64: 1>, scalar_prefetch = 0 : i64, scratch_operands = 0 : i64, tpu.core_type = #tpu.core_type<tc>, window_params = [{transform_indices = @transform_0, window_bounds = array<i64: 8, 8>}, {transform_indices = @transform_1, window_bounds = array<i64: 8, 8>}, {pipeline_mode = #tpu.pipeline_mode<synchronous>, transform_indices = @transform_2, window_bounds = array<i64: 50, 32>}, {pipeline_mode = #tpu.pipeline_mode<synchronous>, transform_indices = @transform_3, window_bounds = array<i64: 32, 256>}, {pipeline_mode = #tpu.pipeline_mode<synchronous>, transform_indices = @transform_4, window_bounds = array<i64: 1, 256>}, {pipeline_mode = #tpu.pipeline_mode<synchronous>, transform_indices = @transform_5, window_bounds = array<i64: 256, 128>}, {pipeline_mode = #tpu.pipeline_mode<synchronous>, transform_indices = @transform_6, window_bounds = array<i64: 1, 128>}, {pipeline_mode = #tpu.pipeline_mode<synchronous>, transform_indices = @transform_7, window_bounds = array<i64: 128, 64>}, {pipeline_mode = #tpu.pipeline_mode<synchronous>, transform_indices = @transform_8, window_bounds = array<i64: 1, 64>}, {transform_indices = @transform_9, window_bounds = array<i64: 8, 128>}]} {
    %c0 = arith.constant 0 : index
    %c0_0 = arith.constant 0 : index
    %0 = vector.load %arg1[%c0, %c0_0] : memref<8x8xi32, #tpu.memory_space<vmem>>, vector<8x8xi32>
    %c0_1 = arith.constant 0 : index
    %c0_2 = arith.constant 0 : index
    %1 = vector.load %arg2[%c0_1, %c0_2] : memref<8x8xi32, #tpu.memory_space<vmem>>, vector<8x8xi32>
    %2 = tpu.concatenate %0, %1 in 0 : vector<8x8xi32>, vector<8x8xi32> -> vector<16x8xi32>
    %3 = tpu.iota {dimensions = array<i32: 1>} : vector<1x50xi32>
    %cst = arith.constant 0.000000e+00 : f32
    %4 = vector.broadcast %cst : f32 to vector<16x50xf32>
    %5 = vector.extract_strided_slice %2 {offsets = [0, 0], sizes = [16, 1], strides = [1, 1]} : vector<16x8xi32> to vector<16x1xi32>
    %6 = vector.broadcast %5 : vector<16x1xi32> to vector<16x50xi32>
    %7 = vector.broadcast %3 : vector<1x50xi32> to vector<16x50xi32>
    %8 = arith.cmpi eq, %6, %7 : vector<16x50xi32>
    %9 = arith.extui %8 : vector<16x50xi1> to vector<16x50xi32>
    %10 = arith.sitofp %9 : vector<16x50xi32> to vector<16x50xf32>
    %11 = arith.addf %4, %10 : vector<16x50xf32>
    %12 = vector.extract_strided_slice %2 {offsets = [0, 1], sizes = [16, 1], strides = [1, 1]} : vector<16x8xi32> to vector<16x1xi32>
    %13 = vector.broadcast %12 : vector<16x1xi32> to vector<16x50xi32>
    %14 = vector.broadcast %3 : vector<1x50xi32> to vector<16x50xi32>
    %15 = arith.cmpi eq, %13, %14 : vector<16x50xi32>
    %16 = arith.extui %15 : vector<16x50xi1> to vector<16x50xi32>
    %17 = arith.sitofp %16 : vector<16x50xi32> to vector<16x50xf32>
    %18 = arith.addf %11, %17 : vector<16x50xf32>
    %19 = vector.extract_strided_slice %2 {offsets = [0, 2], sizes = [16, 1], strides = [1, 1]} : vector<16x8xi32> to vector<16x1xi32>
    %20 = vector.broadcast %19 : vector<16x1xi32> to vector<16x50xi32>
    %21 = vector.broadcast %3 : vector<1x50xi32> to vector<16x50xi32>
    %22 = arith.cmpi eq, %20, %21 : vector<16x50xi32>
    %23 = arith.extui %22 : vector<16x50xi1> to vector<16x50xi32>
    %24 = arith.sitofp %23 : vector<16x50xi32> to vector<16x50xf32>
    %25 = arith.addf %18, %24 : vector<16x50xf32>
    %26 = vector.extract_strided_slice %2 {offsets = [0, 3], sizes = [16, 1], strides = [1, 1]} : vector<16x8xi32> to vector<16x1xi32>
    %27 = vector.broadcast %26 : vector<16x1xi32> to vector<16x50xi32>
    %28 = vector.broadcast %3 : vector<1x50xi32> to vector<16x50xi32>
    %29 = arith.cmpi eq, %27, %28 : vector<16x50xi32>
    %30 = arith.extui %29 : vector<16x50xi1> to vector<16x50xi32>
    %31 = arith.sitofp %30 : vector<16x50xi32> to vector<16x50xf32>
    %32 = arith.addf %25, %31 : vector<16x50xf32>
    %33 = vector.extract_strided_slice %2 {offsets = [0, 4], sizes = [16, 1], strides = [1, 1]} : vector<16x8xi32> to vector<16x1xi32>
    %34 = vector.broadcast %33 : vector<16x1xi32> to vector<16x50xi32>
    %35 = vector.broadcast %3 : vector<1x50xi32> to vector<16x50xi32>
    %36 = arith.cmpi eq, %34, %35 : vector<16x50xi32>
    %37 = arith.extui %36 : vector<16x50xi1> to vector<16x50xi32>
    %38 = arith.sitofp %37 : vector<16x50xi32> to vector<16x50xf32>
    %39 = arith.addf %32, %38 : vector<16x50xf32>
    %40 = vector.extract_strided_slice %2 {offsets = [0, 5], sizes = [16, 1], strides = [1, 1]} : vector<16x8xi32> to vector<16x1xi32>
    %41 = vector.broadcast %40 : vector<16x1xi32> to vector<16x50xi32>
    %42 = vector.broadcast %3 : vector<1x50xi32> to vector<16x50xi32>
    %43 = arith.cmpi eq, %41, %42 : vector<16x50xi32>
    %44 = arith.extui %43 : vector<16x50xi1> to vector<16x50xi32>
    %45 = arith.sitofp %44 : vector<16x50xi32> to vector<16x50xf32>
    %46 = arith.addf %39, %45 : vector<16x50xf32>
    %47 = vector.extract_strided_slice %2 {offsets = [0, 6], sizes = [16, 1], strides = [1, 1]} : vector<16x8xi32> to vector<16x1xi32>
    %48 = vector.broadcast %47 : vector<16x1xi32> to vector<16x50xi32>
    %49 = vector.broadcast %3 : vector<1x50xi32> to vector<16x50xi32>
    %50 = arith.cmpi eq, %48, %49 : vector<16x50xi32>
    %51 = arith.extui %50 : vector<16x50xi1> to vector<16x50xi32>
    %52 = arith.sitofp %51 : vector<16x50xi32> to vector<16x50xf32>
    %53 = arith.addf %46, %52 : vector<16x50xf32>
    %54 = vector.extract_strided_slice %2 {offsets = [0, 7], sizes = [16, 1], strides = [1, 1]} : vector<16x8xi32> to vector<16x1xi32>
    %55 = vector.broadcast %54 : vector<16x1xi32> to vector<16x50xi32>
    %56 = vector.broadcast %3 : vector<1x50xi32> to vector<16x50xi32>
    %57 = arith.cmpi eq, %55, %56 : vector<16x50xi32>
    %58 = arith.extui %57 : vector<16x50xi1> to vector<16x50xi32>
    %59 = arith.sitofp %58 : vector<16x50xi32> to vector<16x50xf32>
    %60 = arith.addf %53, %59 : vector<16x50xf32>
    %c0_3 = arith.constant 0 : index
    %c0_4 = arith.constant 0 : index
    %61 = vector.load %arg3[%c0_3, %c0_4] : memref<50x32xf32, #tpu.memory_space<vmem>>, vector<50x32xf32>
    %cst_5 = arith.constant dense<0.000000e+00> : vector<16x32xf32>
    %62 = tpu.matmul %60, %61, %cst_5 {dimension_numbers = #tpu.dot_dimension_numbers<[1], [0], [0], [1], [0, 0, 1, 1], [], []>} : vector<16x50xf32>, vector<50x32xf32>, vector<16x32xf32> -> vector<16x32xf32>
    %63 = arith.truncf %62 : vector<16x32xf32> to vector<16x32xbf16>
    %c0_6 = arith.constant 0 : index
    %c0_7 = arith.constant 0 : index
    %64 = vector.load %arg4[%c0_6, %c0_7] : memref<32x256xbf16, #tpu.memory_space<vmem>>, vector<32x256xbf16>
    %cst_8 = arith.constant dense<0.000000e+00> : vector<16x256xf32>
    %65 = tpu.matmul %63, %64, %cst_8 {dimension_numbers = #tpu.dot_dimension_numbers<[1], [0], [0], [1], [0, 0, 1, 1], [], []>} : vector<16x32xbf16>, vector<32x256xbf16>, vector<16x256xf32> -> vector<16x256xf32>
    %c0_9 = arith.constant 0 : index
    %c0_10 = arith.constant 0 : index
    %66 = vector.load %arg5[%c0_9, %c0_10] : memref<1x256xf32, #tpu.memory_space<vmem>>, vector<1x256xf32>
    %67 = vector.broadcast %66 : vector<1x256xf32> to vector<16x256xf32>
    %68 = arith.addf %65, %67 : vector<16x256xf32>
    %cst_11 = arith.constant 0.000000e+00 : f32
    %69 = vector.broadcast %cst_11 : f32 to vector<16x256xf32>
    %70 = arith.cmpf ogt, %68, %69 : vector<16x256xf32>
    %cst_12 = arith.constant 0.00999999977 : f32
    %71 = vector.broadcast %cst_12 : f32 to vector<16x256xf32>
    %72 = arith.mulf %71, %68 : vector<16x256xf32>
    %73 = arith.select %70, %68, %72 : vector<16x256xi1>, vector<16x256xf32>
    %74 = arith.truncf %73 : vector<16x256xf32> to vector<16x256xbf16>
    %c0_13 = arith.constant 0 : index
    %c0_14 = arith.constant 0 : index
    %75 = vector.load %arg6[%c0_13, %c0_14] : memref<256x128xbf16, #tpu.memory_space<vmem>>, vector<256x128xbf16>
    %cst_15 = arith.constant dense<0.000000e+00> : vector<16x128xf32>
    %76 = tpu.matmul %74, %75, %cst_15 {dimension_numbers = #tpu.dot_dimension_numbers<[1], [0], [0], [1], [0, 0, 1, 1], [], []>} : vector<16x256xbf16>, vector<256x128xbf16>, vector<16x128xf32> -> vector<16x128xf32>
    %c0_16 = arith.constant 0 : index
    %c0_17 = arith.constant 0 : index
    %77 = vector.load %arg7[%c0_16, %c0_17] : memref<1x128xf32, #tpu.memory_space<vmem>>, vector<1x128xf32>
    %78 = vector.broadcast %77 : vector<1x128xf32> to vector<16x128xf32>
    %79 = arith.addf %76, %78 : vector<16x128xf32>
    %cst_18 = arith.constant 0.000000e+00 : f32
    %80 = vector.broadcast %cst_18 : f32 to vector<16x128xf32>
    %81 = arith.cmpf ogt, %79, %80 : vector<16x128xf32>
    %cst_19 = arith.constant 0.00999999977 : f32
    %82 = vector.broadcast %cst_19 : f32 to vector<16x128xf32>
    %83 = arith.mulf %82, %79 : vector<16x128xf32>
    %84 = arith.select %81, %79, %83 : vector<16x128xi1>, vector<16x128xf32>
    %85 = arith.truncf %84 : vector<16x128xf32> to vector<16x128xbf16>
    %c0_20 = arith.constant 0 : index
    %c0_21 = arith.constant 0 : index
    %86 = vector.load %arg8[%c0_20, %c0_21] : memref<128x64xbf16, #tpu.memory_space<vmem>>, vector<128x64xbf16>
    %cst_22 = arith.constant dense<0.000000e+00> : vector<16x64xf32>
    %87 = tpu.matmul %85, %86, %cst_22 {dimension_numbers = #tpu.dot_dimension_numbers<[1], [0], [0], [1], [0, 0, 1, 1], [], []>} : vector<16x128xbf16>, vector<128x64xbf16>, vector<16x64xf32> -> vector<16x64xf32>
    %c0_23 = arith.constant 0 : index
    %c0_24 = arith.constant 0 : index
    %88 = vector.load %arg9[%c0_23, %c0_24] : memref<1x64xf32, #tpu.memory_space<vmem>>, vector<1x64xf32>
    %89 = vector.broadcast %88 : vector<1x64xf32> to vector<16x64xf32>
    %90 = arith.addf %87, %89 : vector<16x64xf32>
    %cst_25 = arith.constant 0.000000e+00 : f32
    %91 = vector.broadcast %cst_25 : f32 to vector<16x64xf32>
    %92 = arith.cmpf ogt, %90, %91 : vector<16x64xf32>
    %cst_26 = arith.constant 0.00999999977 : f32
    %93 = vector.broadcast %cst_26 : f32 to vector<16x64xf32>
    %94 = arith.mulf %93, %90 : vector<16x64xf32>
    %95 = arith.select %92, %90, %94 : vector<16x64xi1>, vector<16x64xf32>
    %96 = vector.extract_strided_slice %95 {offsets = [0, 0], sizes = [8, 64], strides = [1, 1]} : vector<16x64xf32> to vector<8x64xf32>
    %97 = vector.extract_strided_slice %95 {offsets = [8, 0], sizes = [8, 64], strides = [1, 1]} : vector<16x64xf32> to vector<8x64xf32>
    %98 = arith.mulf %96, %97 : vector<8x64xf32>
    %cst_27 = arith.constant dense<0.000000e+00> : vector<8xf32>
    %99 = vector.multi_reduction <add>, %98, %cst_27 [1] : vector<8x64xf32> to vector<8xf32>
    %100 = vector.shape_cast %99 : vector<8xf32> to vector<8x1xf32>
    %101 = arith.mulf %96, %96 : vector<8x64xf32>
    %cst_28 = arith.constant dense<0.000000e+00> : vector<8xf32>
    %102 = vector.multi_reduction <add>, %101, %cst_28 [1] : vector<8x64xf32> to vector<8xf32>
    %103 = vector.shape_cast %102 : vector<8xf32> to vector<8x1xf32>
    %104 = math.sqrt %103 : vector<8x1xf32>
    %cst_29 = arith.constant 9.99999993E-9 : f32
    %105 = vector.broadcast %cst_29 : f32 to vector<8x1xf32>
    %106 = arith.maximumf %104, %105 : vector<8x1xf32>
    %107 = arith.mulf %97, %97 : vector<8x64xf32>
    %cst_30 = arith.constant dense<0.000000e+00> : vector<8xf32>
    %108 = vector.multi_reduction <add>, %107, %cst_30 [1] : vector<8x64xf32> to vector<8xf32>
    %109 = vector.shape_cast %108 : vector<8xf32> to vector<8x1xf32>
    %110 = math.sqrt %109 : vector<8x1xf32>
    %cst_31 = arith.constant 9.99999993E-9 : f32
    %111 = vector.broadcast %cst_31 : f32 to vector<8x1xf32>
    %112 = arith.maximumf %110, %111 : vector<8x1xf32>
    %113 = arith.mulf %106, %112 : vector<8x1xf32>
    %114 = tpu.reciprocal %113 {approx = true} : vector<8x1xf32> -> vector<8x1xf32>
    %115 = arith.mulf %100, %114 : vector<8x1xf32>
    %cst_32 = arith.constant 0.000000e+00 : f32
    %116 = vector.broadcast %cst_32 : f32 to vector<8x1xf32>
    %117 = arith.cmpf ogt, %115, %116 : vector<8x1xf32>
    %cst_33 = arith.constant 0.00999999977 : f32
    %118 = vector.broadcast %cst_33 : f32 to vector<8x1xf32>
    %119 = arith.mulf %118, %115 : vector<8x1xf32>
    %120 = arith.select %117, %115, %119 : vector<8x1xi1>, vector<8x1xf32>
    %cst_34 = arith.constant 0.000000e+00 : f32
    %cst_35 = arith.constant 1.000000e+00 : f32
    %121 = vector.broadcast %cst_34 : f32 to vector<8x1xf32>
    %122 = arith.maximumf %121, %120 : vector<8x1xf32>
    %123 = vector.broadcast %cst_35 : f32 to vector<8x1xf32>
    %124 = arith.minimumf %123, %122 : vector<8x1xf32>
    %cst_36 = arith.constant 5.000000e-01 : f32
    %125 = vector.broadcast %cst_36 : f32 to vector<8x1xf32>
    %126 = arith.cmpf oge, %124, %125 : vector<8x1xf32>
    %cst_37 = arith.constant 1.000000e+00 : f32
    %cst_38 = arith.constant 0.000000e+00 : f32
    %127 = vector.broadcast %cst_37 : f32 to vector<8x1xf32>
    %128 = vector.broadcast %cst_38 : f32 to vector<8x1xf32>
    %129 = arith.select %126, %127, %128 : vector<8x1xi1>, vector<8x1xf32>
    %130 = tpu.iota {dimensions = array<i32: 1>} : vector<8x128xi32>
    %c0_i32 = arith.constant 0 : i32
    %131 = vector.broadcast %c0_i32 : i32 to vector<8x128xi32>
    %132 = arith.cmpi eq, %130, %131 : vector<8x128xi32>
    %c1_i32 = arith.constant 1 : i32
    %133 = vector.broadcast %c1_i32 : i32 to vector<8x128xi32>
    %134 = arith.cmpi eq, %130, %133 : vector<8x128xi32>
    %cst_39 = arith.constant 0.000000e+00 : f32
    %135 = vector.shape_cast %129 : vector<8x1xf32> to vector<8x1xf32>
    %136 = vector.broadcast %135 : vector<8x1xf32> to vector<8x128xf32>
    %137 = vector.broadcast %cst_39 : f32 to vector<8x128xf32>
    %138 = arith.select %134, %136, %137 : vector<8x128xi1>, vector<8x128xf32>
    %139 = vector.shape_cast %124 : vector<8x1xf32> to vector<8x1xf32>
    %140 = vector.broadcast %139 : vector<8x1xf32> to vector<8x128xf32>
    %141 = arith.select %132, %140, %138 : vector<8x128xi1>, vector<8x128xf32>
    %c0_40 = arith.constant 0 : index
    %c0_41 = arith.constant 0 : index
    %142 = vector.load %arg10[%c0_40, %c0_41] : memref<8x128xf32, #tpu.memory_space<vmem>>, vector<8x128xf32>
    tpu.vector_store %arg10[%c0_40, %c0_41], %141 {strides = array<i32>} : memref<8x128xf32, #tpu.memory_space<vmem>>, vector<8x128xf32>,
    return
  }
  func.func @transform_0(%arg0: i32) -> (i32, i32) {
    %c0_i32 = arith.constant 0 : i32
    %c0_i32_0 = arith.constant 0 : i32
    return %arg0, %c0_i32 : i32, i32
  }
  func.func @transform_1(%arg0: i32) -> (i32, i32) {
    %c0_i32 = arith.constant 0 : i32
    %c0_i32_0 = arith.constant 0 : i32
    return %arg0, %c0_i32 : i32, i32
  }
  func.func @transform_2(%arg0: i32) -> (i32, i32) {
    %c0_i32 = arith.constant 0 : i32
    %c0_i32_0 = arith.constant 0 : i32
    %c0_i32_1 = arith.constant 0 : i32
    return %c0_i32, %c0_i32_0 : i32, i32
  }
  func.func @transform_3(%arg0: i32) -> (i32, i32) {
    %c0_i32 = arith.constant 0 : i32
    %c0_i32_0 = arith.constant 0 : i32
    %c0_i32_1 = arith.constant 0 : i32
    return %c0_i32, %c0_i32_0 : i32, i32
  }
  func.func @transform_4(%arg0: i32) -> (i32, i32) {
    %c0_i32 = arith.constant 0 : i32
    %c0_i32_0 = arith.constant 0 : i32
    %c0_i32_1 = arith.constant 0 : i32
    return %c0_i32, %c0_i32_0 : i32, i32
  }
  func.func @transform_5(%arg0: i32) -> (i32, i32) {
    %c0_i32 = arith.constant 0 : i32
    %c0_i32_0 = arith.constant 0 : i32
    %c0_i32_1 = arith.constant 0 : i32
    return %c0_i32, %c0_i32_0 : i32, i32
  }
  func.func @transform_6(%arg0: i32) -> (i32, i32) {
    %c0_i32 = arith.constant 0 : i32
    %c0_i32_0 = arith.constant 0 : i32
    %c0_i32_1 = arith.constant 0 : i32
    return %c0_i32, %c0_i32_0 : i32, i32
  }
  func.func @transform_7(%arg0: i32) -> (i32, i32) {
    %c0_i32 = arith.constant 0 : i32
    %c0_i32_0 = arith.constant 0 : i32
    %c0_i32_1 = arith.constant 0 : i32
    return %c0_i32, %c0_i32_0 : i32, i32
  }
  func.func @transform_8(%arg0: i32) -> (i32, i32) {
    %c0_i32 = arith.constant 0 : i32
    %c0_i32_0 = arith.constant 0 : i32
    %c0_i32_1 = arith.constant 0 : i32
    return %c0_i32, %c0_i32_0 : i32, i32
  }
  func.func @transform_9(%arg0: i32) -> (i32, i32) {
    %c0_i32 = arith.constant 0 : i32
    %c0_i32_0 = arith.constant 0 : i32
    return %arg0, %c0_i32 : i32, i32
  }
}

</mosaic_0001>

<bundles_post_ra>
// kernel: tpu_custom_call.1
= control target key start
LH: loop header
LB: loop body
LE: loop exit
PB: predicated region body
PF: predicated region fallthrough
CT: control target
= control target key end

     0   :  { %14 = vsyncpa [#allocation3], 0  ;;  %s1213_s0 = inlined_call_operand.vmem [shape: s32[8,8], index: 0, kind: input, shape index: {}]   ;;  %s1214_s1 = inlined_call_operand.hbm [shape: s32[8,8], index: 1, kind: input, shape index: {}]   ;;  %s1215_s2 = inlined_call_operand.vmem [shape: f32[50,32], index: 2, kind: input, shape index: {}]   ;;  %s1216_s3 = inlined_call_operand.vmem [shape: bf16[32,256], index: 3, kind: input, shape index: {}]   ;;  %s1217_s4 = inlined_call_operand.vmem [shape: f32[1,256], index: 4, kind: input, shape index: {}]   ;;  %s1218_s5 = inlined_call_operand.vmem [shape: bf16[256,128], index: 5, kind: input, shape index: {}]   ;;  %s1219_s6 = inlined_call_operand.vmem [shape: f32[1,128], index: 6, kind: input, shape index: {}]   ;;  %s1220_s7 = inlined_call_operand.vmem [shape: bf16[128,64], index: 7, kind: input, shape index: {}]   ;;  %s1221_s8 = inlined_call_operand.vmem [shape: f32[1,64], index: 8, kind: input, shape index: {}]   ;;  %s1222_s9 = inlined_call_operand.hbm [shape: f32[8,128], index: 9, kind: output, shape index: {}]  }
   0x1   :  { %15 = vsyncpa [#allocation4], 0  ;;  %s962_s30 = smov [#allocation2]   ;;  %s914_s13 = scalar_lea.hbm %s1214_s1, 128 }
   0x2   :  { %s24_s10 = sshll.u32 %s962_s30, 4  ;;  %p915_p0 = scmp.ne.s32.totalorder %s1214_s1, %s914_s13  ;;  %s25_s10 = int_to_ptr.vmem [resolvable:$true] %s24_s10 }
   0x3   :  { %p918_p1 = scmp.lt.u32.totalorder %s914_s13, %s1214_s1 }
   0x5   :  { %p920_p2 = pnand %p918_p1, %p915_p0 }
   0x7   :  { %923 = shalt.err (!%p920_p2)
}
   0x8   :  { %s924_s18 = scalar_lea.vmem %s25_s10, 128  ;;  %p929_p4 = scmp.lt.s32.totalorder %s25_s10, %s25_s10 }
   0x9   :  { %p925_p3 = scmp.ne.s32.totalorder %s25_s10, %s924_s18  ;;  %p930_p5 = scmp.lt.s32.totalorder %s924_s18, %s924_s18 }
   0xb   :  { %p931_p6 = por %p930_p5, %p929_p4 }
   0xd   :  { %p932_p7 = pnand %p931_p6, %p925_p3 }
   0xf   :  { %935 = shalt.err (!%p932_p7)
}
  0x10   :  { %27 = dma.hbm_to_vmem [thread:$0]  %s1214_s1, 128, %s25_s10, [#allocation3]  }
  0x11   :  { %958 = dma.done.wait [#allocation3], 128  }
  0x12   :  { %959 = vsyncadd [#allocation3], 4294967168  ;;  %v963_v0 = vmov 0   ;;  %v47_v1 = vld [vmem:[#allocation2] sm:$0xff]  ;;  %v964_v3 = vmov 1   ;;  %v965_v4 = vmov 2   ;;  %v48_v27 = vlaneseq }
  0x13   :  { %866 = vset.pattern.permute.xlu1 %v963_v0  ;;  %864 = vset.pattern.permute.xlu0 %v963_v0  ;;  %v46_v2 = vld [vmem:[%s1213_s0] sm:$0xff]  ;;  %v966_v5 = vmov 3   ;;  %v967_v6 = vmov 4   ;;  %v968_v7 = vmov 5   ;;  %v969_v8 = vmov 7   ;;  %v163_v10 = vld [vmem:[%s1215_s2 + $0x8] sm:$0xff] }
  0x14   :  { %328 = vmatprep.mubr.bf16.mxu1 %v963_v0  ;;  %54 = vperm.xlu1 %866, %v47_v1   ;;  %v162_v9 = vld [vmem:[%s1215_s2] sm:$0xff]  ;;  %v970_v12 = vmov 6   ;;  %v164_v13 = vld [vmem:[%s1215_s2 + $0x10] sm:$0xff]  ;;  %v165_v14 = vld [vmem:[%s1215_s2 + $0x18] sm:$0xff]  ;;  %vm176_vm0 = vcmask 1041408   ;;  %v971_v22 = vmov 0.0  }
  0x15   :  { %51 = vperm.xlu0 %864, %v46_v2   ;;  %v840_v11 = vpack.c.bf16 %v163_v10, %v162_v9  ;;  %v844_v15 = vpack.c.bf16 %v165_v14, %v164_v13  ;;  %v166_v16 = vld [vmem:[%s1215_s2 + $0x20] sm:$0xff]  ;;  %v167_v17 = vld [vmem:[%s1215_s2 + $0x28] sm:$0xff]  ;;  %v168_v19 = vld [vmem:[%s1215_s2 + $0x30] sm:$0x3]  ;;  %v1068_v29 = vand.u32 127, %v48_v27  ;;  %vm169_vm15 = vcmask 408576  }
  0x16   :  { %v848_v18 = vpack.c.bf16 %v167_v17, %v166_v16  ;;  %v878_v20 = vld [vmem:[%s1216_s3 + $0x4] ss:$8 sps:$4 sm:$0xff]   ;;  %v880_v21 = vld [vmem:[%s1216_s3] ss:$8 sps:$4 sm:$0xff]   ;;  %v888_v16 = vld [vmem:[%s1218_s5 + $0x50] sm:$0xff]  }
  0x17   :  { %841 = vmatprep.subr.bf16.mxu0 %v840_v11  ;;  %296 = vmatprep.subr.bf16.mxu1 %v878_v20  ;;  %v884_v9 = vld [vmem:[%s1218_s5 + $0x40] sm:$0xff]   ;;  %v886_v14 = vld [vmem:[%s1218_s5 + $0x48] sm:$0xff]   ;;  %v889_v17 = vld [vmem:[%s1218_s5 + $0x10] sm:$0xff]  }
  0x18   :  { %867 = vset.pattern.permute.xlu1 %v964_v3  ;;  %843 = vmatpush3.bf16.msra.mxu0 %v840_v11  ;;  %v892_v20 = vld [vmem:[%s1218_s5 + $0x60] sm:$0xff]  }
  0x19   :  { %865 = vset.pattern.permute.xlu0 %v964_v3  ;;  %68 = vperm.xlu1 %867, %v47_v1  }
  0x1a   :  { %65 = vperm.xlu0 %865, %v46_v2   ;;  %845 = vmatprep.subr.bf16.mxu0 %v844_v15 }
  0x1b   :  { %297 = vmatpush1.bf16.msra.mxu1 %v880_v21  ;;  %v893_v21 = vld [vmem:[%s1218_s5 + $0x20] sm:$0xff]  }
  0x1c   :  { %847 = vmatpush3.bf16.msra.mxu0 %v844_v15  ;;  %v887_v15 = vld [vmem:[%s1218_s5 + $0x8] sm:$0xff]  }
  0x1d   :  { %868 = vset.pattern.permute.xlu1 %v965_v4  ;;  %849 = vmatprep.subr.bf16.mxu0 %v848_v18 }
  0x1e   :  { %869 = vset.pattern.permute.xlu0 %v965_v4  ;;  %79 = vperm.xlu1 %868, %v46_v2  }
  0x1f   :  { %82 = vperm.xlu0 %869, %v47_v1  }
  0x20   :  { %851 = vmatpush3.bf16.msra.mxu0 %v848_v18  ;;  %v890_v18 = vld [vmem:[%s1218_s5 + $0x58] sm:$0xff]  }
  0x21   :  { %815 = vmatprep.subr.msk.mxu0 %vm176_vm0, %v168_v19 }
  0x22   :  { %870 = vset.pattern.permute.xlu1 %v966_v5 }
  0x23   :  { %871 = vset.pattern.permute.xlu0 %v967_v6  ;;  %93 = vperm.xlu1 %870, %v46_v2  }
  0x24   :  { %107 = vperm.xlu0 %871, %v46_v2   ;;  %816 = vmatpush3.msk.msra.mxu0 %vm176_vm0, %v168_v19  ;;  %v891_v19 = vld [vmem:[%s1218_s5 + $0x18] sm:$0xff]  }
  0x25   :  { %820 = vmatprep.subr.bf16.mxu0 %v971_v22 }
  0x27   :  { %96 = vperm.xlu1 %870, %v47_v1  }
  0x28   :  { %874 = vset.pattern.permute.xlu0 %v968_v7 }
  0x29   :  { %124 = vperm.xlu0 %874, %v47_v1  }
  0x2b   :  { %872 = vset.pattern.permute.xlu1 %v967_v6 }
  0x2c   :  { %110 = vperm.xlu1 %872, %v47_v1  }
  0x2d   :  { %876 = vset.pattern.permute.xlu0 %v969_v8 }
  0x2e   :  { %149 = vperm.xlu0 %876, %v46_v2  }
  0x30   :  { %873 = vset.pattern.permute.xlu1 %v968_v7  ;;  %v881_v7 = vld [vmem:[%s1216_s3 + $0x14] ss:$8 sps:$4 sm:$0xff]  }
  0x31   :  { %121 = vperm.xlu1 %873, %v46_v2   ;;  %298 = vmatprep.subr.bf16.mxu1 %v881_v7 }
  0x35   :  { %875 = vset.pattern.permute.xlu1 %v970_v12  ;;  %v885_v12 = vld [vmem:[%s1218_s5] sm:$0xff]  }
  0x36   :  { %135 = vperm.xlu1 %875, %v46_v2  }
  0x3a   :  { %138 = vperm.xlu1 %875, %v47_v1  }
  0x3e   :  { %877 = vset.pattern.permute.xlu1 %v969_v8  ;;  %v883_v8 = vld [vmem:[%s1216_s3 + $0x10] ss:$8 sps:$4 sm:$0xff]  }
  0x3f   :  { %152 = vperm.xlu1 %877, %v47_v1   ;;  %299 = vmatpush1.bf16.msra.mxu1 %v883_v8 }
  0x40   :  { %772 = vmatprep.subr.bf16.mxu1 %v884_v9 }
  0x93   :  { %v55_v23 = vpop.permute.xlu1 %54 }
  0x94   :  { %v52_v25 = vpop.permute.xlu0 %51  ;;  %vm57_vm7 = vcmp.eq.s32.totalorder %v55_v23, %v1068_v29  ;;  %v894_v23 = vld [vmem:[%s1218_s5 + $0x68] sm:$0xff]  }
  0x95   :  { %vm56_vm1 = vcmp.eq.s32.totalorder %v52_v25, %v1068_v29  ;;  %v714_v47 = vsel %vm57_vm7, 1.0, %v971_v22  ;;  %v896_v25 = vld [vmem:[%s1218_s5 + $0x70] sm:$0xff]   ;;  %vm972_vm7 = vmmov 0  }
  0x96   :  { %v713_v33 = vsel %vm56_vm1, 1.0, %v971_v22 }
  0x98   :  { %v69_v24 = vpop.permute.xlu1 %68 }
  0x99   :  { %v66_v28 = vpop.permute.xlu0 %65  ;;  %vm71_vm5 = vcmp.eq.s32.totalorder %v69_v24, %v1068_v29  ;;  %v895_v24 = vld [vmem:[%s1218_s5 + $0x28] sm:$0xff]  }
  0x9a   :  { %vm70_vm2 = vcmp.eq.s32.totalorder %v66_v28, %v1068_v29  ;;  %v716_v42 = vsel %vm71_vm5, 1.0, %v971_v22  ;;  %v898_v28 = vld [vmem:[%s1218_s5 + $0x78] sm:$0xff]  }
  0x9b   :  { %v715_v34 = vsel %vm70_vm2, 1.0, %v971_v22  ;;  %v77_v49 = vadd.f32 %v716_v42, %v714_v47  ;;  %vm292_vm2 = vcmask 261120  }
  0x9c   :  { %v76_v36 = vadd.f32 %v715_v34, %v713_v33  ;;  %v902_v33 = vld [vmem:[%s1220_s7 + $0x10] sm:$0xff]   ;;  %v903_v34 = vld [vmem:[%s1220_s7 + $0x18] sm:$0xff]  }
  0x9d   :  { %v80_v26 = vpop.permute.xlu1 %79 }
  0x9e   :  { %v83_v31 = vpop.permute.xlu0 %82  ;;  %vm84_vm3 = vcmp.eq.s32.totalorder %v80_v26, %v1068_v29  ;;  %v897_v26 = vld [vmem:[%s1218_s5 + $0x30] sm:$0xff]  }
  0x9f   :  { %v717_v37 = vsel %vm84_vm3, 1.0, %v971_v22  ;;  %vm85_vm8 = vcmp.eq.s32.totalorder %v83_v31, %v1068_v29  ;;  %v900_v31 = vld [vmem:[%s1220_s7] sm:$0xff]  }
  0xa0   :  { %v90_v41 = vadd.f32 %v717_v37, %v76_v36  ;;  %v718_v48 = vsel %vm85_vm8, 1.0, %v971_v22  ;;  %v263_v36 = vshrl.u32 %v48_v27, 7 }
  0xa1   :  { %v91_v53 = vadd.f32 %v718_v48, %v77_v49 }
  0xa2   :  { %v94_v30 = vpop.permute.xlu1 %93  ;;  %v264_v37 = vsub.s32 0, %v263_v36 }
  0xa3   :  { %v108_v35 = vpop.permute.xlu0 %107  ;;  %vm98_vm4 = vcmp.eq.s32.totalorder %v94_v30, %v1068_v29  ;;  %v899_v30 = vld [vmem:[%s1218_s5 + $0x38] sm:$0xff]  }
  0xa4   :  { %v719_v39 = vsel %vm98_vm4, 1.0, %v971_v22  ;;  %vm112_vm6 = vcmp.eq.s32.totalorder %v108_v35, %v1068_v29  ;;  %v904_v35 = vld [vmem:[%s1220_s7 + $0x20] sm:$0xff]  }
  0xa5   :  { %v104_v43 = vadd.f32 %v719_v39, %v90_v41  ;;  %v721_v45 = vsel %vm112_vm6, 1.0, %v971_v22  ;;  %v268_v39 = vsub.s32 1, %v263_v36 }
  0xa6   :  { %v97_v32 = vpop.permute.xlu1 %96 }
  0xa7   :  { %vm99_vm9 = vcmp.eq.s32.totalorder %v97_v32, %v1068_v29  ;;  %v118_v51 = vadd.f32 %v721_v45, %v104_v43  ;;  %v901_v32 = vld [vmem:[%s1220_s7 + $0x8] sm:$0xff]  }
  0xa8   :  { %v125_v40 = vpop.permute.xlu0 %124  ;;  %v720_v52 = vsel %vm99_vm9, 1.0, %v971_v22 }
  0xa9   :  { %v105_v57 = vadd.f32 %v720_v52, %v91_v53  ;;  %vm127_vm14 = vcmp.eq.s32.totalorder %v125_v40, %v1068_v29 }
  0xaa   :  { %v724_v63 = vsel %vm127_vm14, 1.0, %v971_v22 }
  0xab   :  { %v111_v38 = vpop.permute.xlu1 %110 }
  0xac   :  { %vm113_vm11 = vcmp.eq.s32.totalorder %v111_v38, %v1068_v29  ;;  %v260_v38 = vld [vmem:[%s1217_s4] sm:$0x3] }
  0xad   :  { %v150_v46 = vpop.permute.xlu0 %149  ;;  %v722_v55 = vsel %vm113_vm11, 1.0, %v971_v22  ;;  %v265_v40 = vrot.slane %v260_v38, %v264_v37  ;;  %v269_v41 = vrot.slane %v260_v38, %v268_v39 }
  0xae   :  { %vm154_vm12 = vcmp.eq.s32.totalorder %v150_v46, %v1068_v29  ;;  %v119_v61 = vadd.f32 %v722_v55, %v105_v57 }
  0xaf   :  { %v727_v59 = vsel %vm154_vm12, 1.0, %v971_v22  ;;  %vm655_vm12 = vcmask 523264  }
  0xb0   :  { %v122_v44 = vpop.permute.xlu1 %121  ;;  %v133_v2 = vadd.f32 %v724_v63, %v119_v61  ;;  %v907_v61 = vld [vmem:[%s1220_s7 + $0x38] sm:$0xff]   ;;  %v737_v63 = vld [vmem:[%s1219_s6] ss:$0 sm:$0xff]  ;;  %s973_s6 = smov [#allocation5]  }
  0xb1   :  { %vm126_vm10 = vcmp.eq.s32.totalorder %v122_v44, %v1068_v29 }
  0xb2   :  { %v723_v50 = vsel %vm126_vm10, 1.0, %v971_v22 }
  0xb3   :  { %v132_v56 = vadd.f32 %v723_v50, %v118_v51 }
  0xb5   :  { %v136_v54 = vpop.permute.xlu1 %135 }
  0xb6   :  { %vm140_vm13 = vcmp.eq.s32.totalorder %v136_v54, %v1068_v29 }
  0xb7   :  { %v725_v58 = vsel %vm140_vm13, 1.0, %v971_v22 }
  0xb8   :  { %v146_v60 = vadd.f32 %v725_v58, %v132_v56 }
  0xb9   :  { %v139_v62 = vpop.permute.xlu1 %138 }
  0xba   :  { %vm141_vm0 = vcmp.eq.s32.totalorder %v139_v62, %v1068_v29  ;;  %v160_v0 = vadd.f32 %v727_v59, %v146_v60  ;;  %v905_v59 = vld [vmem:[%s1220_s7 + $0x28] sm:$0xff]   ;;  %v906_v60 = vld [vmem:[%s1220_s7 + $0x30] sm:$0xff]  }
  0xbb   :  { %v726_v1 = vsel %vm141_vm0, 1.0, %v971_v22 }
  0xbc   :  { %817 = vmatprep.mubr.msk.f32.mxu0 %vm169_vm15, %v160_v0  ;;  %v147_v4 = vadd.f32 %v726_v1, %v133_v2 }
  0xbe   :  { %v153_v3 = vpop.permute.xlu1 %152 }
  0xbf   :  { %vm155_vm1 = vcmp.eq.s32.totalorder %v153_v3, %v1068_v29 }
  0xc0   :  { %v728_v5 = vsel %vm155_vm1, 1.0, %v971_v22 }
  0xc1   :  { %v161_v6 = vadd.f32 %v728_v5, %v147_v4 }
  0xc3   :  { %818 = vmatmul.mubr.msk.f32.vlgmr.msra.gmra.mrb[0].mxu0 %vm169_vm15, %v161_v6 }
  0xc4   :  { %821 = vmatpush3.bf16.msra.mxu0 %v900_v31  ;;  %836 = vmatprep.mubr.msk.bf16.mxu0 %vm972_vm7, %v971_v22 }
  0xc5   :  { %822 = vmatprep.subr.bf16.mxu0 %v971_v22 }
  0xc8   :  { %823 = vmatpush3.bf16.msra.mxu0 %v901_v32 }
  0xc9   :  { %824 = vmatprep.subr.bf16.mxu0 %v971_v22 }
  0xcc   :  { %825 = vmatpush3.bf16.msra.mxu0 %v902_v33 }
  0xcd   :  { %826 = vmatprep.subr.bf16.mxu0 %v971_v22 }
  0xd0   :  { %827 = vmatpush3.bf16.msra.mxu0 %v903_v34 }
  0xd1   :  { %828 = vmatprep.subr.bf16.mxu0 %v971_v22 }
  0xd4   :  { %829 = vmatpush3.bf16.msra.mxu0 %v904_v35 }
  0xd5   :  { %830 = vmatprep.subr.bf16.mxu0 %v971_v22 }
  0xd8   :  { %831 = vmatpush3.bf16.msra.mxu0 %v905_v59 }
  0xd9   :  { %832 = vmatprep.subr.bf16.mxu0 %v971_v22 }
  0xdc   :  { %833 = vmatpush3.bf16.msra.mxu0 %v906_v60 }
  0xdd   :  { %834 = vmatprep.subr.bf16.mxu0 %v971_v22 }
  0xe0   :  { %835 = vmatpush3.bf16.msra.mxu0 %v907_v61 }
 0x196   :  { %v819_v10 = vpop.f32.mrb[0].mxu0 }
 0x197   :  { %v246_v11 = vpop.f32.mrb[1].mxu0 }
 0x198   :  { %v255_v13 = vpack.c.bf16 %v819_v10, %v246_v11 }
 0x19a   :  { %736 = vmatmul.mubr.msk.bf16.vlgmr.msra.gmra.mrb[0].mxu1 %vm292_vm2, %v255_v13  ;;  %vm694_vm2 = vcmp.eq.s32.totalorder %v1068_v29, 1 }
 0x19b   :  { %773 = vmatpush3.bf16.msra.mxu1 %v885_v12  ;;  %v754_v12 = vld [vmem:[%s1221_s8] ss:$0 sm:$0xff]  ;;  %s704_s8 = sshll.u32 %s973_s6, 4  ;;  %s705_s8 = int_to_ptr.vmem [resolvable:$true] %s704_s8 }
 0x19c   :  { %774 = vmatprep.subr.bf16.mxu1 %v886_v14  ;;  %s936_s22 = scalar_lea.vmem %s705_s8, 128  ;;  %p941_p9 = scmp.lt.s32.totalorder %s705_s8, %s705_s8 }
 0x19d   :  { %p937_p8 = scmp.ne.s32.totalorder %s705_s8, %s936_s22  ;;  %p942_p10 = scmp.lt.s32.totalorder %s936_s22, %s936_s22 }
 0x19f   :  { %775 = vmatpush3.bf16.msra.mxu1 %v887_v15  ;;  %p943_p11 = por %p942_p10, %p941_p9 }
 0x1a0   :  { %776 = vmatprep.subr.bf16.mxu1 %v888_v16 }
 0x1a1   :  { %p944_p12 = pnand %p943_p11, %p937_p8 }
 0x1a3   :  { %777 = vmatpush3.bf16.msra.mxu1 %v889_v17 }
 0x1a4   :  { %778 = vmatprep.subr.bf16.mxu1 %v890_v18 }
 0x1a7   :  { %779 = vmatpush3.bf16.msra.mxu1 %v891_v19 }
 0x1a8   :  { %780 = vmatprep.subr.bf16.mxu1 %v892_v20 }
 0x1ab   :  { %781 = vmatpush3.bf16.msra.mxu1 %v893_v21 }
 0x1ac   :  { %782 = vmatprep.subr.bf16.mxu1 %v894_v23 }
 0x1af   :  { %783 = vmatpush3.bf16.msra.mxu1 %v895_v24 }
 0x1b0   :  { %784 = vmatprep.subr.bf16.mxu1 %v896_v25 }
 0x1b3   :  { %785 = vmatpush3.bf16.msra.mxu1 %v897_v26 }
 0x1b4   :  { %786 = vmatprep.subr.bf16.mxu1 %v898_v28 }
 0x1b7   :  { %787 = vmatpush3.bf16.msra.mxu1 %v899_v30 }
 0x26d   :  { %v330_v42 = vpop.f32.mrb[0].mxu1 }
 0x26e   :  { %v331_v43 = vadd.f32 %v330_v42, %v265_v40  ;;  %v332_v44 = vpop.f32.mrb[1].mxu1 }
 0x26f   :  { %v333_v45 = vadd.f32 %v332_v44, %v269_v41  ;;  %v334_v46 = vpop.f32.mrb[2].mxu1 }
 0x270   :  { %v343_v47 = vmul.f32 0.01, %v331_v43  ;;  %v335_v48 = vadd.f32 %v334_v46, %v265_v40  ;;  %v336_v49 = vpop.f32.mrb[3].mxu1  ;;  %vm339_vm3 = vcmp.gt.f32.partialorder %v331_v43, 0.0 }
 0x271   :  { %v344_v50 = vmul.f32 0.01, %v333_v45  ;;  %v337_v51 = vadd.f32 %v336_v49, %v269_v41  ;;  %vm340_vm4 = vcmp.gt.f32.partialorder %v333_v45, 0.0 }
 0x272   :  { %vm341_vm5 = vcmp.gt.f32.partialorder %v335_v48, 0.0  ;;  %v345_v27 = vmul.f32 0.01, %v335_v48  ;;  %v347_v53 = vsel %vm339_vm3, %v331_v43, %v343_v47 }
 0x273   :  { %vm342_vm6 = vcmp.gt.f32.partialorder %v337_v51, 0.0  ;;  %v346_v52 = vmul.f32 0.01, %v337_v51  ;;  %v348_v56 = vsel %vm340_vm4, %v333_v45, %v344_v50  ;;  %vm693_vm4 = vcmp.eq.s32.totalorder %v1068_v29, 0 }
 0x274   :  { %v349_v54 = vsel %vm341_vm5, %v335_v48, %v345_v27 }
 0x275   :  { %v351_v55 = vpack.c.bf16 %v349_v54, %v347_v53  ;;  %v350_v57 = vsel %vm342_vm6, %v337_v51, %v346_v52 }
 0x276   :  { %v352_v58 = vpack.c.bf16 %v350_v57, %v348_v56 }
 0x278   :  { %520 = vmatprep.mubr.bf16.mxu1 %v352_v58 }
 0x279   :  { %521 = vmatmul.mubr.bf16.vlgmr.msra.gmra.mrb[4].mxu1 %v351_v55 }
 0x34c   :  { %v788_v62 = vpop.f32.mrb[4].mxu1 }
 0x34d   :  { %v789_v0 = vpop.f32.mrb[5].mxu1 }
 0x34e   :  { %v790_v1 = vadd.f32 %v789_v0, %v788_v62  ;;  %v791_v2 = vpop.f32.mrb[6].mxu1 }
 0x34f   :  { %v792_v3 = vpop.f32.mrb[7].mxu1 }
 0x350   :  { %v523_v4 = vadd.f32 %v790_v1, %v737_v63  ;;  %v793_v5 = vadd.f32 %v792_v3, %v791_v2 }
 0x352   :  { %v531_v6 = vmul.f32 0.01, %v523_v4  ;;  %v526_v7 = vadd.f32 %v793_v5, %v737_v63  ;;  %vm529_vm8 = vcmp.gt.f32.partialorder %v523_v4, 0.0 }
 0x354   :  { %vm530_vm9 = vcmp.gt.f32.partialorder %v526_v7, 0.0  ;;  %v532_v8 = vmul.f32 0.01, %v526_v7  ;;  %v533_v9 = vsel %vm529_vm8, %v523_v4, %v531_v6 }
 0x356   :  { %v534_v10 = vsel %vm530_vm9, %v526_v7, %v532_v8 }
 0x357   :  { %v535_v11 = vpack.c.bf16 %v534_v10, %v533_v9 }
 0x359   :  { %837 = vmatmul.mubr.bf16.vlgmr.msra.gmra.mrb[4].mxu0 %v535_v11 }
 0x42c   :  { %v641_v13 = vpop.f32.mrb[4].mxu0 }
 0x42d   :  { %v642_v14 = vadd.f32 %v754_v12, %v641_v13  ;;  %v838_v15 = vpop.f32.mrb[5].mxu0 }
 0x42e   :  { %v644_v16 = vpop.f32.mrb[6].mxu0 }
 0x42f   :  { %vm648_vm10 = vcmp.gt.f32.partialorder %v642_v14, 0.0  ;;  %v650_v17 = vmul.f32 0.01, %v642_v14  ;;  %v645_v18 = vadd.f32 %v754_v12, %v644_v16  ;;  %v839_v19 = vpop.f32.mrb[7].mxu0 }
 0x431   :  { %vm649_vm11 = vcmp.gt.f32.partialorder %v645_v18, 0.0  ;;  %v651_v20 = vmul.f32 0.01, %v645_v18  ;;  %v652_v21 = vsel %vm648_vm10, %v642_v14, %v650_v17 }
 0x432   :  { %v659_v23 = vmul.f32 %v652_v21, %v652_v21 }
 0x433   :  { %v653_v24 = vsel %vm649_vm11, %v645_v18, %v651_v20 }
 0x434   :  { %v660_v25 = vsel %vm655_vm12, %v659_v23, 0.0  ;;  %v671_v26 = vmul.f32 %v653_v24, %v653_v24  ;;  %v654_v28 = vmul.f32 %v653_v24, %v652_v21 }
 0x435   :  { %661 = vadd.xlane.f32.xlu1 %v660_v25 }
 0x436   :  { %v672_v30 = vsel %vm655_vm12, %v671_v26, 0.0  ;;  %v656_v31 = vsel %vm655_vm12, %v654_v28, 0.0 }
 0x437   :  { %673 = vadd.xlane.f32.xlu0 %v672_v30 }
 0x43b   :  { %657 = vadd.xlane.f32.xlu0 %v656_v31 }
 0x4c2   :  { %v662_v32 = vpop.xlane.xlu1 %661 }
 0x4c3   :  { %908 = vrsqrt.f32 %v662_v32  ;;  %vm665_vm13 = vcmp.eq.f32.partialorder %v662_v32, inf  ;;  %v668_v37 = vand.u32 2147483648, %v662_v32  ;;  %vm667_vm14 = vcmp.eq.f32.partialorder %v662_v32, 0.0 }
 0x4c4   :  { %v674_v33 = vpop.xlane.xlu0 %673 }
 0x4c5   :  { %910 = vrsqrt.f32 %v674_v33  ;;  %vm677_vm15 = vcmp.eq.f32.partialorder %v674_v33, inf  ;;  %v680_v41 = vand.u32 2147483648, %v674_v33  ;;  %vm679_vm0 = vcmp.eq.f32.partialorder %v674_v33, 0.0 }
 0x4c8   :  { %v658_v48 = vpop.xlane.xlu0 %657 }
 0x4cd   :  { %v909_v34 = vpop.eup %908 }
 0x4ce   :  { %v664_v35 = vmul.f32 %v909_v34, %v662_v32 }
 0x4cf   :  { %v911_v36 = vpop.eup %910 }
 0x4d0   :  { %v666_v38 = vsel %vm665_vm13, %v662_v32, %v664_v35  ;;  %v676_v39 = vmul.f32 %v911_v36, %v674_v33 }
 0x4d1   :  { %v669_v40 = vsel %vm667_vm14, %v668_v37, %v666_v38 }
 0x4d2   :  { %v678_v42 = vsel %vm677_vm15, %v674_v33, %v676_v39  ;;  %v670_v44 = vmax.f32 %v669_v40, 1e-08 }
 0x4d3   :  { %v681_v43 = vsel %vm679_vm0, %v680_v41, %v678_v42 }
 0x4d4   :  { %v682_v45 = vmax.f32 %v681_v43, 1e-08 }
 0x4d6   :  { %v683_v46 = vmul.f32 %v682_v45, %v670_v44 }
 0x4d8   :  { %912 = vrcp.f32 %v683_v46 }
 0x4e2   :  { %v913_v47 = vpop.eup %912 }
 0x4e3   :  { %v685_v49 = vmul.f32 %v913_v47, %v658_v48 }
 0x4e5   :  { %vm686_vm1 = vcmp.gt.f32.partialorder %v685_v49, 0.0  ;;  %v687_v50 = vmul.f32 0.01, %v685_v49 }
 0x4e7   :  { %v688_v51 = vsel %vm686_vm1, %v685_v49, %v687_v50 }
 0x4e8   :  { %v689_v27 = vmax.f32 %v688_v51, 0.0 }
 0x4ea   :  { %v690_v52 = vmin.f32 %v689_v27, 1.0 }
 0x4ec   :  { %vm691_vm3 = vcmp.ge.f32.partialorder %v690_v52, 0.5 }
 0x4ed   :  { %v692_v53 = vsel %vm691_vm3, 1.0, %v971_v22 }
 0x4ee   :  { %v695_v54 = vsel %vm694_vm2, %v692_v53, 0.0 }
 0x4ef   :  { %v696_v55 = vsel %vm693_vm4, %v690_v52, %v695_v54 }
 0x4f0   :  { %697 = vst [vmem:[#allocation5] sm:$0xff] %v696_v55 }
 0x4f1   :  { %947 = shalt.err (!%p944_p12)
}
 0x4f2   :  { %s948_s23 = scalar_lea.hbm %s1222_s9, 128 }
 0x4f3   :  { %p949_p13 = scmp.ne.s32.totalorder %s1222_s9, %s948_s23  ;;  %p952_p0 = scmp.lt.u32.totalorder %s948_s23, %s1222_s9 }
 0x4f5   :  { %p954_p1 = pnand %p952_p0, %p949_p13 }
 0x4f7   :  { %957 = shalt.err (!%p954_p1)
}
 0x4f8   :  { %707 = dma.vmem_to_hbm [thread:$0]  %s705_s8, 128, %s1222_s9, [#allocation4]  }
 0x4f9   :  { %960 = dma.done.wait [#allocation4], 128  }
 0x4fa   :  { %961 = vsyncadd [#allocation4], 4294967168 }
 0x4fb   :  { %711 = vsyncpa [#allocation3], 1 }
 0x4fc   :  { %712 = vsyncpa [#allocation4], 1 }

</bundles_post_ra>
